<compile_context>
chip_gen: v7x
topology: tpu7x:2x2x1
jax: 0.10.0
libtpu: 0.0.40
codegen_flags: <defaults>
</compile_context>

<pallas_src>
import math
import functools

import jax
import jax.numpy as jnp
from jax import lax
from jax.experimental import pallas as pl
from jax.experimental.pallas import tpu as pltpu


_MASK_VALUE = -1e30  # finite "-inf" for padded key columns (avoids inf-inf)


# --------------------------------------------------------------------------
# Kernel helpers (shared by the fused and pre-projected variants)
# --------------------------------------------------------------------------

def _attn_step(kv, q_tile, k_ref, v_ref, m_scr, l_scr, acc_scr, *, mask_cfg):
    """One online-softmax step over a single k/v tile.

    q_tile (tq, C) bf16, k_ref (tk, C) bf16, v_ref (tk, D) bf16.
    m/l/acc scratch stay f32.
    """
    # scores = q @ k^T, contracting dims so the MXU consumes k untransposed.
    s = lax.dot_general(q_tile, k_ref[...],
                        (((1,), (1,)), ((), ())),
                        preferred_element_type=jnp.float32)          # (tq, tk)

    if mask_cfg is not None:
        tk, sk_valid = mask_cfg           # static: tile width, true Sk
        col = kv * tk + lax.broadcasted_iota(jnp.int32, s.shape, 1)
        s = jnp.where(col < sk_valid, s, _MASK_VALUE)

    m_prev = m_scr[...]
    m_new = jnp.maximum(m_prev, jnp.max(s, axis=-1, keepdims=True))
    alpha = jnp.exp(m_prev - m_new)
    p = jnp.exp(s - m_new)                                           # (tq, tk) f32

    l_scr[...] = alpha * l_scr[...] + jnp.sum(p, axis=-1, keepdims=True)
    acc_scr[...] = alpha * acc_scr[...] + jnp.dot(
        p.astype(v_ref.dtype), v_ref[...],
        preferred_element_type=jnp.float32)                          # (tq, D)
    m_scr[...] = m_new


def _init_state(m_scr, l_scr, acc_scr):
    m_scr[...] = jnp.full_like(m_scr, -jnp.inf)
    l_scr[...] = jnp.zeros_like(l_scr)
    acc_scr[...] = jnp.zeros_like(acc_scr)


def _finalize(o_ref, wvt_ref, l_scr, acc_scr):
    # Exact normalization (runs once per (batch, q-tile); cost negligible).
    av = (acc_scr[...] / l_scr[...]).astype(wvt_ref.dtype)           # (tq, D) bf16
    o_ref[...] = jnp.dot(av, wvt_ref[...],
                         preferred_element_type=jnp.float32).astype(o_ref.dtype)


# --------------------------------------------------------------------------
# Kernel variants
# --------------------------------------------------------------------------

def _flash_fused_kernel(q_ref, k_ref, v_ref, wqk_ref, wvt_ref, o_ref,
                        q_scr, m_scr, l_scr, acc_scr, *, scale, mask_cfg):
    """H >= D path: raw q/k, fused (D,D) weight Wq^T@Wk, contract over D."""
    kv = pl.program_id(2)

    @pl.when(kv == 0)
    def _init():
        qp = jnp.dot(q_ref[...], wqk_ref[...],
                     preferred_element_type=jnp.float32)
        q_scr[...] = (qp * scale).astype(q_scr.dtype)
        _init_state(m_scr, l_scr, acc_scr)

    _attn_step(kv, q_scr[...], k_ref, v_ref, m_scr, l_scr, acc_scr,
               mask_cfg=mask_cfg)

    @pl.when(kv == pl.num_programs(2) - 1)
    def _fin():
        _finalize(o_ref, wvt_ref, l_scr, acc_scr)


def _flash_proj_kernel(q_ref, k_ref, v_ref, wvt_ref, o_ref,
                       m_scr, l_scr, acc_scr, *, mask_cfg):
    """H < D path: q/k pre-projected (and q pre-scaled) in wrapper, contract over H."""
    kv = pl.program_id(2)

    @pl.when(kv == 0)
    def _init():
        _init_state(m_scr, l_scr, acc_scr)

    _attn_step(kv, q_ref[...], k_ref, v_ref, m_scr, l_scr, acc_scr,
               mask_cfg=mask_cfg)

    @pl.when(kv == pl.num_programs(2) - 1)
    def _fin():
        _finalize(o_ref, wvt_ref, l_scr, acc_scr)


# --------------------------------------------------------------------------
# Wrapper
# --------------------------------------------------------------------------

def _round_up(x, m):
    return ((x + m - 1) // m) * m


def _pad_axis(x, axis, target):
    cur = x.shape[axis]
    if cur == target:
        return x
    widths = [(0, 0)] * x.ndim
    widths[axis] = (0, target - cur)
    return jnp.pad(x, widths)


def _vmem_capacity_bytes():
    try:
        return int(pltpu.get_tpu_info().vmem_capacity_bytes)
    except Exception:
        return 64 * 1024 * 1024  # conservative (v7x per-core)


def attention_forward(query, key, value, wq, wk, wv, *, tq_cap=256, tk_cap=512):
    """Pallas forward pass of the Attention module.

    query: (B, Sq, D), key/value: (B, Sk, D)
    wq, wk: (H, D), wv: (O, D)   (torch.nn.Linear storage: x @ W.T)
    returns: (B, Sq, O)
    """
    B, Sq, D = query.shape
    _, Sk, _ = key.shape
    H = wq.shape[0]
    O = wv.shape[0]
    out_dtype = query.dtype
    cdtype = jnp.bfloat16  # MXU operand dtype; accumulation stays f32

    scale = 1.0 / math.sqrt(H)
    fuse_qk = H >= D   # conditional Wq^T@Wk fusion (contract over min(H, D))

    # ---- tiling: 128-friendly, pad awkward lengths in the wrapper ----------
    tq_cap = max(8, (tq_cap // 8) * 8)
    tk_cap = max(8, (tk_cap // 8) * 8)
    if Sq <= tq_cap:
        tq = _round_up(Sq, 8)
        Sq_pad = tq
    else:
        tq = tq_cap
        Sq_pad = _round_up(Sq, tq)
    if Sk <= tk_cap:
        tk = _round_up(Sk, 8)
        Sk_pad = tk
    else:
        tk = tk_cap                      # caller defaults are 128-multiples
        Sk_pad = _round_up(Sk, tk)
    nq, nk = Sq_pad // tq, Sk_pad // tk
    mask_cfg = (tk, Sk) if Sk_pad != Sk else None

    # ---- wrapper-side prep (hoisted out of the per-tile kernel) ------------
    if fuse_qk:
        # scores = q (Wq^T Wk) k^T : fuse weights in f32, downcast operand.
        q_in = query.astype(cdtype)
        k_in = key.astype(cdtype)
        w_qk = jnp.dot(wq.T.astype(jnp.float32), wk.astype(jnp.float32),
                       preferred_element_type=jnp.float32).astype(cdtype)
        Cq = D
    else:
        # Pre-project q/k once (plain XLA matmuls, f32), fold scale into q,
        # downcast the streamed operands -> in-kernel contraction over H < D.
        q_in = (jnp.einsum("bsd,hd->bsh", query.astype(jnp.float32),
                           wq.astype(jnp.float32)) * scale).astype(cdtype)
        k_in = jnp.einsum("bsd,hd->bsh", key.astype(jnp.float32),
                          wk.astype(jnp.float32)).astype(cdtype)
        w_qk = None
        Cq = H
    v_in = value.astype(cdtype)

    # Lane-dense output: pad O up to a multiple of 128 (full vst, not vst.msk).
    O_pad = max(128, _round_up(O, 128))
    wv_t = jnp.zeros((D, O_pad), dtype=cdtype).at[:, :O].set(wv.T.astype(cdtype))

    # Sequence padding (zero q rows sliced off; padded k columns masked).
    q_in = _pad_axis(q_in, 1, Sq_pad)
    k_in = _pad_axis(k_in, 1, Sk_pad)
    v_in = _pad_axis(v_in, 1, Sk_pad)

    # ---- block specs --------------------------------------------------------
    q_spec = pl.BlockSpec((None, tq, Cq), lambda b, qi, ki: (b, qi, 0))
    k_spec = pl.BlockSpec((None, tk, Cq), lambda b, qi, ki: (b, ki, 0))
    v_spec = pl.BlockSpec((None, tk, D), lambda b, qi, ki: (b, ki, 0))
    wvt_spec = pl.BlockSpec((D, O_pad), lambda b, qi, ki: (0, 0))
    out_spec = pl.BlockSpec((None, tq, O_pad), lambda b, qi, ki: (b, qi, 0))

    common_scratch = [
        pltpu.VMEM((tq, 1), jnp.float32),   # running max
        pltpu.VMEM((tq, 1), jnp.float32),   # running denom
        pltpu.VMEM((tq, D), jnp.float32),   # output accumulator (pre-Wv)
    ]

    if fuse_qk:
        kernel = functools.partial(_flash_fused_kernel, scale=scale,
                                   mask_cfg=mask_cfg)
        in_specs = [q_spec, k_spec, v_spec,
                    pl.BlockSpec((D, D), lambda b, qi, ki: (0, 0)),
                    wvt_spec]
        args = (q_in, k_in, v_in, w_qk, wv_t)
        scratch = [pltpu.VMEM((tq, Cq), cdtype)] + common_scratch
    else:
        kernel = functools.partial(_flash_proj_kernel, mask_cfg=mask_cfg)
        in_specs = [q_spec, k_spec, v_spec, wvt_spec]
        args = (q_in, k_in, v_in, wv_t)
        scratch = common_scratch

    # ---- VMEM budget (generation-aware) and cost estimate -------------------
    bfb = 2
    outb = jnp.dtype(out_dtype).itemsize
    wqk_elems = D * D if fuse_qk else 0
    est = (2 * (tq * Cq + tk * Cq + tk * D) * bfb       # double-buffered q/k/v
           + 2 * tq * O_pad * outb                      # double-buffered out
           + 2 * (wqk_elems + D * O_pad) * bfb          # weight blocks
           + tq * Cq * bfb                              # q_scr (fused only)
           + tq * (2 + D) * 4)                          # m/l/acc f32 scratch
    cap = _vmem_capacity_bytes()
    vmem_limit = int(min(0.75 * cap, max(32 * 1024 * 1024, 4 * est)))

    flops = 2 * B * Sq_pad * Sk_pad * (Cq + D) + 2 * B * Sq_pad * D * O_pad
    if fuse_qk:
        flops += 2 * B * Sq_pad * D * D
    transcendentals = B * Sq_pad * Sk_pad
    bytes_accessed = (B * Sq_pad * Cq * bfb
                      + nq * B * Sk_pad * (Cq + D) * bfb
                      + B * Sq_pad * O_pad * outb
                      + (wqk_elems + D * O_pad) * bfb)
    cost = pl.CostEstimate(flops=int(flops),
                           transcendentals=int(transcendentals),
                           bytes_accessed=int(bytes_accessed))

    out_padded = pl.pallas_call(
        kernel,
        out_shape=jax.ShapeDtypeStruct((B, Sq_pad, O_pad), out_dtype),
        grid_spec=pltpu.PrefetchScalarGridSpec(
            num_scalar_prefetch=0,
            grid=(B, nq, nk),              # reduction (k/v tiles) axis last
            in_specs=in_specs,
            out_specs=out_spec,
            scratch_shapes=scratch),
        compiler_params=pltpu.CompilerParams(
            dimension_semantics=("parallel", "parallel", "arbitrary"),
            vmem_limit_bytes=vmem_limit),
        cost_estimate=cost,
    )(*args)

    return out_padded[:, :Sq, :O]


# --------------------------------------------------------------------------
# Reference + test harness
# --------------------------------------------------------------------------

def attention_reference(query, key, value, wq, wk, wv):
    """Pure-JAX reference mirroring the PyTorch forward."""
    q = query @ wq.T
    k = key @ wk.T
    d_k = q.shape[-1]
    scores = jnp.einsum("bqh,bkh->bqk", q, k) / math.sqrt(d_k)
    p = jax.nn.softmax(scores, axis=-1)
    av = jnp.einsum("bqk,bkd->bqd", p, value)
    return av @ wv.T


def _run_case(rng_key, B, Sq, Sk, init_size, hidden_size, output_size,
              **tile_kw):
    k_q, k_k, k_v, k_wq, k_wk, k_wv = jax.random.split(rng_key, 6)

    query = jax.random.normal(k_q, (B, Sq, init_size), dtype=jnp.float32)
    key_in = jax.random.normal(k_k, (B, Sk, init_size), dtype=jnp.float32)
    value = jax.random.normal(k_v, (B, Sk, init_size), dtype=jnp.float32)

    # nn.Linear(bias=False) default init: U(-1/sqrt(fan_in), 1/sqrt(fan_in))
    bound = 1.0 / math.sqrt(init_size)
    wq = jax.random.uniform(k_wq, (hidden_size, init_size),
                            minval=-bound, maxval=bound, dtype=jnp.float32)
    wk = jax.random.uniform(k_wk, (hidden_size, init_size),
                            minval=-bound, maxval=bound, dtype=jnp.float32)
    wv = jax.random.uniform(k_wv, (output_size, init_size),
                            minval=-bound, maxval=bound, dtype=jnp.float32)

    out = attention_forward(query, key_in, value, wq, wk, wv, **tile_kw)
    out = jax.block_until_ready(out)

    ref = attention_reference(query, key_in, value, wq, wk, wv)
    assert out.shape == (B, Sq, output_size), out.shape
    # bf16 MXU operands (f32 accumulation) -> slightly loose tolerance.
    err = jnp.max(jnp.abs(out - ref))
    assert jnp.allclose(out, ref, atol=3e-2, rtol=3e-2), f"max abs err {err}"


if __name__ == "__main__":
    root = jax.random.PRNGKey(0)
    key1, key2 = jax.random.split(root, 2)

    # Case 1: H >= D -> fused Wq^T@Wk path, single tile per batch element.
    _run_case(key1, B=2, Sq=8, Sk=8, init_size=32, hidden_size=32,
              output_size=16)

    # Case 2: H < D -> pre-projected path; awkward lengths exercise q-row
    # padding and padded-key-column masking across 2 q-tiles x 2 kv-tiles.
    _run_case(key2, B=2, Sq=120, Sk=200, init_size=64, hidden_size=32,
              output_size=16, tq_cap=64, tk_cap=128)

    print("KERNEL_OK")
</pallas_src>

<mosaic_0001>
module attributes {stable_mosaic.version = 11 : i64} {
  func.func @_flash_fused_kernel(%arg0: i32, %arg1: i32, %arg2: i32, %arg3: memref<1x8x32xbf16, #tpu.memory_space<vmem>>, %arg4: memref<1x8x32xbf16, #tpu.memory_space<vmem>>, %arg5: memref<1x8x32xbf16, #tpu.memory_space<vmem>>, %arg6: memref<32x32xbf16, #tpu.memory_space<vmem>>, %arg7: memref<32x128xbf16, #tpu.memory_space<vmem>>, %arg8: memref<1x8x128xf32, #tpu.memory_space<vmem>>, %arg9: memref<8x32xbf16, #tpu.memory_space<vmem>>, %arg10: memref<8x1xf32, #tpu.memory_space<vmem>>, %arg11: memref<8x1xf32, #tpu.memory_space<vmem>>, %arg12: memref<8x32xf32, #tpu.memory_space<vmem>>) attributes {dimension_semantics = [#tpu.dimension_semantics<parallel>, #tpu.dimension_semantics<parallel>, #tpu.dimension_semantics<arbitrary>], iteration_bounds = array<i64: 2, 1, 1>, scalar_prefetch = 0 : i64, scratch_operands = 4 : i64, tpu.core_type = #tpu.core_type<tc>, window_params = [{transform_indices = @transform_0, window_bounds = array<i64: 1, 8, 32>}, {transform_indices = @transform_1, window_bounds = array<i64: 1, 8, 32>}, {transform_indices = @transform_2, window_bounds = array<i64: 1, 8, 32>}, {pipeline_mode = #tpu.pipeline_mode<synchronous>, transform_indices = @transform_3, window_bounds = array<i64: 32, 32>}, {pipeline_mode = #tpu.pipeline_mode<synchronous>, transform_indices = @transform_4, window_bounds = array<i64: 32, 128>}, {transform_indices = @transform_5, window_bounds = array<i64: 1, 8, 128>}]} {
    %c0_i32 = arith.constant 0 : i32
    %0 = arith.cmpi eq, %arg2, %c0_i32 : i32
    %1 = arith.extui %0 : i1 to i32
    %c0_i32_0 = arith.constant 0 : i32
    %2 = arith.cmpi ne, %1, %c0_i32_0 : i32
    scf.if %2 {
      %c0_25 = arith.constant 0 : index
      %c0_26 = arith.constant 0 : index
      %c0_27 = arith.constant 0 : index
      %35 = vector.load %arg3[%c0_25, %c0_26, %c0_27] : memref<1x8x32xbf16, #tpu.memory_space<vmem>>, vector<1x8x32xbf16>
      %36 = vector.shape_cast %35 : vector<1x8x32xbf16> to vector<8x32xbf16>
      %c0_28 = arith.constant 0 : index
      %c0_29 = arith.constant 0 : index
      %37 = vector.load %arg6[%c0_28, %c0_29] : memref<32x32xbf16, #tpu.memory_space<vmem>>, vector<32x32xbf16>
      %cst_30 = arith.constant dense<0.000000e+00> : vector<8x32xf32>
      %38 = tpu.matmul %36, %37, %cst_30 {dimension_numbers = #tpu.dot_dimension_numbers<[1], [0], [0], [1], [0, 0, 1, 1], [], []>} : vector<8x32xbf16>, vector<32x32xbf16>, vector<8x32xf32> -> vector<8x32xf32>
      %cst_31 = arith.constant 0.176776692 : f32
      %39 = vector.broadcast %cst_31 : f32 to vector<8x32xf32>
      %40 = arith.mulf %38, %39 : vector<8x32xf32>
      %41 = arith.truncf %40 : vector<8x32xf32> to vector<8x32xbf16>
      %c0_32 = arith.constant 0 : index
      %c0_33 = arith.constant 0 : index
      %42 = vector.load %arg9[%c0_32, %c0_33] : memref<8x32xbf16, #tpu.memory_space<vmem>>, vector<8x32xbf16>
      tpu.vector_store %arg9[%c0_32, %c0_33], %41 {strides = array<i32>} : memref<8x32xbf16, #tpu.memory_space<vmem>>, vector<8x32xbf16>,
      %cst_34 = arith.constant 0xFF800000 : f32
      %43 = vector.broadcast %cst_34 : f32 to vector<8x1xf32>
      %c0_35 = arith.constant 0 : index
      %c0_36 = arith.constant 0 : index
      %44 = vector.load %arg10[%c0_35, %c0_36] : memref<8x1xf32, #tpu.memory_space<vmem>>, vector<8x1xf32>
      tpu.vector_store %arg10[%c0_35, %c0_36], %43 {strides = array<i32>} : memref<8x1xf32, #tpu.memory_space<vmem>>, vector<8x1xf32>,
      %cst_37 = arith.constant 0.000000e+00 : f32
      %45 = vector.broadcast %cst_37 : f32 to vector<8x1xf32>
      %c0_38 = arith.constant 0 : index
      %c0_39 = arith.constant 0 : index
      %46 = vector.load %arg11[%c0_38, %c0_39] : memref<8x1xf32, #tpu.memory_space<vmem>>, vector<8x1xf32>
      tpu.vector_store %arg11[%c0_38, %c0_39], %45 {strides = array<i32>} : memref<8x1xf32, #tpu.memory_space<vmem>>, vector<8x1xf32>,
      %cst_40 = arith.constant 0.000000e+00 : f32
      %47 = vector.broadcast %cst_40 : f32 to vector<8x32xf32>
      %c0_41 = arith.constant 0 : index
      %c0_42 = arith.constant 0 : index
      %48 = vector.load %arg12[%c0_41, %c0_42] : memref<8x32xf32, #tpu.memory_space<vmem>>, vector<8x32xf32>
      tpu.vector_store %arg12[%c0_41, %c0_42], %47 {strides = array<i32>} : memref<8x32xf32, #tpu.memory_space<vmem>>, vector<8x32xf32>,
    } else {
    }
    %c0 = arith.constant 0 : index
    %c0_1 = arith.constant 0 : index
    %3 = vector.load %arg9[%c0, %c0_1] : memref<8x32xbf16, #tpu.memory_space<vmem>>, vector<8x32xbf16>
    %c0_2 = arith.constant 0 : index
    %c0_3 = arith.constant 0 : index
    %c0_4 = arith.constant 0 : index
    %4 = vector.load %arg4[%c0_2, %c0_3, %c0_4] : memref<1x8x32xbf16, #tpu.memory_space<vmem>>, vector<1x8x32xbf16>
    %5 = vector.shape_cast %4 : vector<1x8x32xbf16> to vector<8x32xbf16>
    %cst = arith.constant dense<0.000000e+00> : vector<8x8xf32>
    %6 = tpu.matmul %3, %5, %cst {dimension_numbers = #tpu.dot_dimension_numbers<[1], [1], [0], [0], [0, 0, 1, 0], [], []>} : vector<8x32xbf16>, vector<8x32xbf16>, vector<8x8xf32> -> vector<8x8xf32>
    %c0_5 = arith.constant 0 : index
    %c0_6 = arith.constant 0 : index
    %7 = vector.load %arg10[%c0_5, %c0_6] : memref<8x1xf32, #tpu.memory_space<vmem>>, vector<8x1xf32>
    %cst_7 = arith.constant dense<0xFF800000> : vector<8xf32>
    %8 = vector.multi_reduction <maximumf>, %6, %cst_7 [1] : vector<8x8xf32> to vector<8xf32>
    %9 = vector.shape_cast %8 : vector<8xf32> to vector<8x1xf32>
    %10 = arith.maximumf %7, %9 : vector<8x1xf32>
    %11 = arith.subf %7, %10 : vector<8x1xf32>
    %12 = math.exp %11 : vector<8x1xf32>
    %13 = vector.broadcast %10 : vector<8x1xf32> to vector<8x8xf32>
    %14 = arith.subf %6, %13 : vector<8x8xf32>
    %15 = math.exp %14 : vector<8x8xf32>
    %c0_8 = arith.constant 0 : index
    %c0_9 = arith.constant 0 : index
    %16 = vector.load %arg11[%c0_8, %c0_9] : memref<8x1xf32, #tpu.memory_space<vmem>>, vector<8x1xf32>
    %17 = arith.mulf %12, %16 : vector<8x1xf32>
    %cst_10 = arith.constant dense<0.000000e+00> : vector<8xf32>
    %18 = vector.multi_reduction <add>, %15, %cst_10 [1] : vector<8x8xf32> to vector<8xf32>
    %19 = vector.shape_cast %18 : vector<8xf32> to vector<8x1xf32>
    %20 = arith.addf %17, %19 : vector<8x1xf32>
    %c0_11 = arith.constant 0 : index
    %c0_12 = arith.constant 0 : index
    %21 = vector.load %arg11[%c0_11, %c0_12] : memref<8x1xf32, #tpu.memory_space<vmem>>, vector<8x1xf32>
    tpu.vector_store %arg11[%c0_11, %c0_12], %20 {strides = array<i32>} : memref<8x1xf32, #tpu.memory_space<vmem>>, vector<8x1xf32>,
    %c0_13 = arith.constant 0 : index
    %c0_14 = arith.constant 0 : index
    %22 = vector.load %arg12[%c0_13, %c0_14] : memref<8x32xf32, #tpu.memory_space<vmem>>, vector<8x32xf32>
    %23 = vector.broadcast %12 : vector<8x1xf32> to vector<8x32xf32>
    %24 = arith.mulf %23, %22 : vector<8x32xf32>
    %25 = arith.truncf %15 : vector<8x8xf32> to vector<8x8xbf16>
    %c0_15 = arith.constant 0 : index
    %c0_16 = arith.constant 0 : index
    %c0_17 = arith.constant 0 : index
    %26 = vector.load %arg5[%c0_15, %c0_16, %c0_17] : memref<1x8x32xbf16, #tpu.memory_space<vmem>>, vector<1x8x32xbf16>
    %27 = vector.shape_cast %26 : vector<1x8x32xbf16> to vector<8x32xbf16>
    %cst_18 = arith.constant dense<0.000000e+00> : vector<8x32xf32>
    %28 = tpu.matmul %25, %27, %cst_18 {dimension_numbers = #tpu.dot_dimension_numbers<[1], [0], [0], [1], [0, 0, 1, 1], [], []>} : vector<8x8xbf16>, vector<8x32xbf16>, vector<8x32xf32> -> vector<8x32xf32>
    %29 = arith.addf %24, %28 : vector<8x32xf32>
    %c0_19 = arith.constant 0 : index
    %c0_20 = arith.constant 0 : index
    %30 = vector.load %arg12[%c0_19, %c0_20] : memref<8x32xf32, #tpu.memory_space<vmem>>, vector<8x32xf32>
    tpu.vector_store %arg12[%c0_19, %c0_20], %29 {strides = array<i32>} : memref<8x32xf32, #tpu.memory_space<vmem>>, vector<8x32xf32>,
    %c0_21 = arith.constant 0 : index
    %c0_22 = arith.constant 0 : index
    %31 = vector.load %arg10[%c0_21, %c0_22] : memref<8x1xf32, #tpu.memory_space<vmem>>, vector<8x1xf32>
    tpu.vector_store %arg10[%c0_21, %c0_22], %10 {strides = array<i32>} : memref<8x1xf32, #tpu.memory_space<vmem>>, vector<8x1xf32>,
    %c0_i32_23 = arith.constant 0 : i32
    %32 = arith.cmpi eq, %arg2, %c0_i32_23 : i32
    %33 = arith.extui %32 : i1 to i32
    %c0_i32_24 = arith.constant 0 : i32
    %34 = arith.cmpi ne, %33, %c0_i32_24 : i32
    scf.if %34 {
      %c0_25 = arith.constant 0 : index
      %c0_26 = arith.constant 0 : index
      %35 = vector.load %arg12[%c0_25, %c0_26] : memref<8x32xf32, #tpu.memory_space<vmem>>, vector<8x32xf32>
      %c0_27 = arith.constant 0 : index
      %c0_28 = arith.constant 0 : index
      %36 = vector.load %arg11[%c0_27, %c0_28] : memref<8x1xf32, #tpu.memory_space<vmem>>, vector<8x1xf32>
      %37 = vector.broadcast %36 : vector<8x1xf32> to vector<8x32xf32>
      %38 = arith.divf %35, %37 : vector<8x32xf32>
      %39 = arith.truncf %38 : vector<8x32xf32> to vector<8x32xbf16>
      %c0_29 = arith.constant 0 : index
      %c0_30 = arith.constant 0 : index
      %40 = vector.load %arg7[%c0_29, %c0_30] : memref<32x128xbf16, #tpu.memory_space<vmem>>, vector<32x128xbf16>
      %cst_31 = arith.constant dense<0.000000e+00> : vector<8x128xf32>
      %41 = tpu.matmul %39, %40, %cst_31 {dimension_numbers = #tpu.dot_dimension_numbers<[1], [0], [0], [1], [0, 0, 1, 1], [], []>} : vector<8x32xbf16>, vector<32x128xbf16>, vector<8x128xf32> -> vector<8x128xf32>
      %c0_32 = arith.constant 0 : index
      %c0_33 = arith.constant 0 : index
      %c0_34 = arith.constant 0 : index
      %42 = vector.load %arg8[%c0_32, %c0_33, %c0_34] : memref<1x8x128xf32, #tpu.memory_space<vmem>>, vector<1x8x128xf32>
      %43 = vector.shape_cast %42 : vector<1x8x128xf32> to vector<8x128xf32>
      %44 = vector.shape_cast %41 : vector<8x128xf32> to vector<1x8x128xf32>
      tpu.vector_store %arg8[%c0_32, %c0_33, %c0_34], %44 {strides = array<i32>} : memref<1x8x128xf32, #tpu.memory_space<vmem>>, vector<1x8x128xf32>,
    } else {
    }
    return
  }
  func.func @transform_0(%arg0: i32, %arg1: i32, %arg2: i32) -> (i32, i32, i32) {
    %c0_i32 = arith.constant 0 : i32
    %c0_i32_0 = arith.constant 0 : i32
    return %arg0, %arg1, %c0_i32 : i32, i32, i32
  }
  func.func @transform_1(%arg0: i32, %arg1: i32, %arg2: i32) -> (i32, i32, i32) {
    %c0_i32 = arith.constant 0 : i32
    %c0_i32_0 = arith.constant 0 : i32
    return %arg0, %arg2, %c0_i32 : i32, i32, i32
  }
  func.func @transform_2(%arg0: i32, %arg1: i32, %arg2: i32) -> (i32, i32, i32) {
    %c0_i32 = arith.constant 0 : i32
    %c0_i32_0 = arith.constant 0 : i32
    return %arg0, %arg2, %c0_i32 : i32, i32, i32
  }
  func.func @transform_3(%arg0: i32, %arg1: i32, %arg2: i32) -> (i32, i32) {
    %c0_i32 = arith.constant 0 : i32
    %c0_i32_0 = arith.constant 0 : i32
    %c0_i32_1 = arith.constant 0 : i32
    return %c0_i32, %c0_i32_0 : i32, i32
  }
  func.func @transform_4(%arg0: i32, %arg1: i32, %arg2: i32) -> (i32, i32) {
    %c0_i32 = arith.constant 0 : i32
    %c0_i32_0 = arith.constant 0 : i32
    %c0_i32_1 = arith.constant 0 : i32
    return %c0_i32, %c0_i32_0 : i32, i32
  }
  func.func @transform_5(%arg0: i32, %arg1: i32, %arg2: i32) -> (i32, i32, i32) {
    %c0_i32 = arith.constant 0 : i32
    %c0_i32_0 = arith.constant 0 : i32
    return %arg0, %arg1, %c0_i32 : i32, i32, i32
  }
}

</mosaic_0001>

<bundles_post_ra>
// kernel: tpu_custom_call.1
= control target key start
LH: loop header
LB: loop body
LE: loop exit
PB: predicated region body
PF: predicated region fallthrough
CT: control target
= control target key end

     0   :  { %s1624_s0 = inlined_call_operand.hbm [shape: bf16[2,8,32], index: 0, kind: input, shape index: {}]   ;;  %s1625_s1 = inlined_call_operand.hbm [shape: bf16[2,8,32], index: 1, kind: input, shape index: {}]   ;;  %s1626_s2 = inlined_call_operand.hbm [shape: bf16[2,8,32], index: 2, kind: input, shape index: {}]   ;;  %s1627_s3 = inlined_call_operand.hbm [shape: bf16[32,32], index: 3, kind: input, shape index: {}]   ;;  %s1628_s4 = inlined_call_operand.hbm [shape: bf16[32,128], index: 4, kind: input, shape index: {}]   ;;  %s1629_s5 = inlined_call_operand.hbm [shape: f32[2,8,128], index: 5, kind: output, shape index: {}]  }
   0x1   :  { %1646 = sst [smem:[#allocation23_spill]] %s1625_s1 }
   0x2   :  { %1647 = sst [smem:[#allocation24_spill]] %s1627_s3 }
   0x3   :  { %1648 = sst [smem:[#allocation25_spill]] %s1628_s4 }
   0x4   :  { %10 = vsyncpa [#allocation7], 0 }
   0x5   :  { %12 = vsyncpa [#allocation7 + $0x1], 0 }
   0x6   :  { %13 = vsyncpa [#allocation10], 0 }
   0x7   :  { %15 = vsyncpa [#allocation10 + $0x1], 0 }
   0x8   :  { %16 = vsyncpa [#allocation13], 0 }
   0x9   :  { %17 = vsyncpa [#allocation8], 0 }
   0xa   :  { %19 = vsyncpa [#allocation8 + $0x1], 0  ;;  %s1272_s18 = smov 0   ;;  %s1274_s19 = smov 0  }
   0xb   :  { %s1276_s20 = smov 0   ;;  %s1278_s21 = smov 0  }
   0xc   :  { %s1280_s22 = smov 0   ;;  %s1282_s23 = smov 0  }
   0xd LB: > { %1649 = sst [smem:[#allocation20_spill]] %s1224_s22  ;;  %s1303_s24 = sadd.s32 4294967295, %s1228_s23   ;;  %s1228_s23 = sphi %s1282_s23, %s25_s23   ;;  %s1224_s22 = sphi %s1280_s22, %s1681_s22   ;;  %s1220_s21 = sphi %s1278_s21, %s1680_s21   ;;  %s1216_s20 = sphi %s1276_s20, %s1684_s20   ;;  %s1212_s19 = sphi %s1274_s19, %s1683_s19   ;;  %s1208_s18 = sphi %s1272_s18, %s1682_s18  }
   0xe   : > { %s813_s25 = sadd.s32 4294967294, %s1228_s23   ;;  %p66_p0 = scmp.ne.s32.totalorder %s1212_s19, %s1208_s18 }
   0xf   : > { %p1630_p1 = scmp.eq.s32.totalorder %s1303_s24, 0  ;;  %p196_p3 = scmp.eq.s32.totalorder %s813_s25, 1 }
  0x10   : > { %p814_p5 = scmp.ge.s32.totalorder %s1228_s23, 1  ;;  %p203_p7 = scmp.lt.s32.totalorder %s1228_s23, 3 }
  0x11   : > { %p1312_p4 = por %p1630_p1, %p66_p0  ;;  %p1317_p6 = por %p196_p3, %p66_p0 }
  0x12   : > { %p1322_p8 = pnand %p814_p5, %p203_p7  ;;  %s1230_s29 = smov [#allocation12]  }
  0x13   : > { %s1650_s26 = scalar_select %p1312_p4, 1, 0 }
  0x14   : > { %s1651_s27 = scalar_select %p1317_p6, 1, 0 }
  0x15   : > { %s1652_s28 = scalar_select %p1322_p8, 1, 0 }
  0x16   : > { %s215_s30 = sshll.u32 %s1230_s29, 4  ;;  %p897_p9 = pneg %p1322_p8  ;;  %s216_s30 = int_to_ptr.vmem [resolvable:$true] %s215_s30 }
  0x17   : > { %s44_s7 = sadd.s32 1, %s1224_s22  ;;  %s1654_s3 = sld [smem:[#allocation24_spill]] }
  0x18   : > { %p1331_p11 = pnand %p897_p9, %p1630_p1 }
  0x1a   : > { %s1653_s6 = scalar_select %p1331_p11, 1, 0 }
  0x1b   : > { %p1638_p13 = pneg %p1331_p11 }
  0x1d   : > { %s992_s10 = scalar_lea.hbm %s1654_s3, 256 }
  0x1e   : > { %p993_p12 = scmp.ne.s32.totalorder %s1654_s3, %s992_s10  ;;  %p999_p5 = scmp.lt.u32.totalorder %s992_s10, %s1654_s3 }
  0x20   : > { %p995_p0 = pnand %p1638_p13, %p993_p12 }
  0x22   : > { %p996_p3 = pneg %p995_p0 }
  0x24   : > { %p1001_p7 = pnand %p999_p5, %p996_p3 }
  0x26   : > { %1004 = shalt.err (!%p1001_p7)
}
  0x27   : > { %s1005_s15 = scalar_lea.vmem %s216_s30, 256  ;;  %p1013_p2 = scmp.lt.s32.totalorder %s216_s30, %s216_s30 }
  0x28   : > { %p1006_p9 = scmp.ne.s32.totalorder %s216_s30, %s1005_s15  ;;  %p1014_p6 = scmp.lt.s32.totalorder %s1005_s15, %s1005_s15 }
  0x2a   : > { %p1008_p10 = pnand %p1006_p9, %p1638_p13  ;;  %p1015_p4 = por %p1014_p6, %p1013_p2 }
  0x2c   : > { %p1009_p1 = pneg %p1008_p10 }
  0x2e   : > { %p1016_p8 = pnand %p1015_p4, %p1009_p1 }
  0x30   : > { %1019 = shalt.err (!%p1016_p8)
}
  0x31   : > { %s1634_s16 = smov 64   ;;  %s1635_s17 = smov 4  }
  0x32   : > { %900 = dma.hbm_to_vmem [thread:$0]  (!%p1331_p11), %s1654_s3, 256, %s216_s30, [#allocation13], %s1634_s16, %s1634_s16, %s1635_s17  }
  0x33   : > { %p46_p1 = scmp.ge.s32.totalorder %s44_s7, 2  ;;  %s53_s8 = sadd.s32 1, %s1216_s20 }
  0x34   : > { %p60_p2 = scmp.ne.s32.totalorder %s1216_s20, %s1212_s19  ;;  %p61_p4 = scmp.eq.s32.totalorder %s1228_s23, 0 }
  0x35   : > { %s1686_s7 = smov (%p46_p1, %s44_s7), 0  ;;  %p1656_p8 = scmp.eq.s32.totalorder %s1303_s24, 1 }
  0x36   : > { %1655 = sst [smem:[#allocation21_spill]] %s1686_s7  ;;  %p62_p6 = por %p61_p4, %p60_p2 }
  0x37   : > { %p1369_p10 = por %p1656_p8, %p60_p2  ;;  %s48_s10 = ssub.s32 %s1224_s22, %s1686_s7 }
  0x38   : > { %p920_p12 = scmp.lt.s32.totalorder %s1228_s23, 2  ;;  %p51_p0 = scmp.eq.s32.totalorder %s48_s10, 0 }
  0x39   : > { %s1657_s9 = scalar_select %p1369_p10, 1, 0 }
  0x3a   : > { %s1633_s11 = sand.u32 1, %s1216_s20   ;;  %s1382_s12 = sshll.u32 %s1224_s22, 6 }
  0x3b   : > { %s1379_s30 = sshll.u32 %s1633_s11, 2  ;;  %p1387_p3 = pnand %p920_p12, %p62_p6 }
  0x3c   : > { %s1385_s13 = scalar_select %p51_p0, %s1216_s20, %s53_s8  }
  0x3d   : > { %s1659_s14 = scalar_select %p1387_p3, 1, 0 }
  0x3e   : > { %1658 = sst [smem:[#allocation22_spill]] %s1385_s13  ;;  %s261_s15 = sand.u32 1, %s1228_s23  }
  0x3f   : > { %s1660_s1 = sld [smem:[#allocation23_spill]]  ;;  %s265_s11 = scalar_lea.vmem [#allocation9], %s1379_s30 }
  0x40   : > { %s273_s16 = sshll.u32 %s265_s11, 4  ;;  %s1233_s8 = smov [#allocation14]   ;;  %s1399_s16 = int_to_ptr.vmem [resolvable:$true] %s273_s16 }
  0x41   : > { %s1401_s17 = sshll.u32 %s1233_s8, 4  ;;  %s1403_s3 = scalar_lea.sflag [#allocation10], %s261_s15  ;;  %s229_s17 = int_to_ptr.vmem [resolvable:$true] %s1401_s17 }
  0x42   : > { %p1409_p7 = pneg %p1387_p3 }
  0x44   : > { %s1661_s25 = scalar_select %p1409_p7, 1, 0 }
  0x45   : > { %s1396_s10 = scalar_lea.hbm %s1660_s1, %s1382_s12  ;;  %s1025_s22 = scalar_lea.hbm %s1660_s1, 128 }
  0x46   : > { %s1020_s7 = scalar_lea.hbm %s1396_s10, 64  ;;  %p1026_p2 = scmp.lt.u32.totalorder %s1396_s10, %s1660_s1 }
  0x47   : > { %p1021_p5 = scmp.ne.s32.totalorder %s1396_s10, %s1020_s7  ;;  %p1027_p4 = scmp.lt.u32.totalorder %s1025_s22, %s1020_s7 }
  0x48   : > { %p1029_p8 = scmp.lt.u32.totalorder %s1020_s7, %s1396_s10 }
  0x49   : > { %p1023_p9 = pnand %p1409_p7, %p1021_p5  ;;  %p1028_p6 = por %p1027_p4, %p1026_p2 }
  0x4b   : > { %p1024_p1 = pneg %p1023_p9  ;;  %p1030_p12 = por %p1029_p8, %p1028_p6 }
  0x4d   : > { %p1031_p0 = pnand %p1030_p12, %p1024_p1 }
  0x4f   : > { %1034 = shalt.err (!%p1031_p0)
}
  0x50   : > { %s1035_s15 = scalar_lea.vmem %s1399_s16, 64  ;;  %s1234_s29 = smov [#allocation9]  }
  0x51   : > { %p1036_p5 = scmp.ne.s32.totalorder %s1399_s16, %s1035_s15  ;;  %s1040_s11 = sshll.u32 %s1234_s29, 4  ;;  %s1041_s11 = int_to_ptr.vmem [resolvable:$false] %s1040_s11 }
  0x52   : > { %s1042_s13 = scalar_lea.vmem %s1041_s11, 128  ;;  %p1043_p10 = scmp.lt.s32.totalorder %s1399_s16, %s1041_s11 }
  0x53   : > { %p1038_p9 = pnand %p1036_p5, %p1409_p7  ;;  %p1044_p11 = scmp.lt.s32.totalorder %s1042_s13, %s1035_s15 }
  0x55   : > { %p1039_p13 = pneg %p1038_p9  ;;  %p1045_p2 = por %p1044_p11, %p1043_p10 }
  0x57   : > { %p1046_p4 = pnand %p1045_p2, %p1039_p13 }
  0x59   : > { %1049 = shalt.err (!%p1046_p4)
}
  0x5a   : > { %910 = dma.hbm_to_vmem [thread:$0]  (!%p1387_p3), %s1396_s10, 64, %s1399_s16, %s1403_s3  }
  0x5b   : > { %s1662_s4 = sld [smem:[#allocation25_spill]]  ;;  %p1663_p11 = scmp.ne.s32.totalorder %s1653_s6, 0 }
  0x5d   : > { %p1664_p13 = pneg %p1663_p11 }
  0x61   : > { %s1050_s8 = scalar_lea.hbm %s1662_s4, 256 }
  0x62   : > { %p1051_p1 = scmp.ne.s32.totalorder %s1662_s4, %s1050_s8  ;;  %p1057_p8 = scmp.lt.u32.totalorder %s1050_s8, %s1662_s4 }
  0x64   : > { %p1053_p10 = pnand %p1051_p1, %p1664_p13 }
  0x66   : > { %p1054_p6 = pneg %p1053_p10 }
  0x68   : > { %p1059_p12 = pnand %p1057_p8, %p1054_p6 }
  0x6a   : > { %1062 = shalt.err (!%p1059_p12)
}
  0x6b   : > { %s1063_s16 = scalar_lea.vmem %s229_s17, 256  ;;  %p1665_p5 = pmov %p1664_p13 }
  0x6c   : > { %p1064_p0 = scmp.ne.s32.totalorder %s229_s17, %s1063_s16  ;;  %p1071_p4 = scmp.lt.s32.totalorder %s229_s17, %s229_s17 }
  0x6d   : > { %p1072_p3 = scmp.lt.s32.totalorder %s1063_s16, %s1063_s16 }
  0x6e   : > { %p1066_p9 = pnand %p1064_p0, %p1665_p5 }
  0x6f   : > { %p1073_p7 = por %p1072_p3, %p1071_p4 }
  0x70   : > { %p1067_p2 = pneg %p1066_p9 }
  0x72   : > { %p1074_p1 = pnand %p1073_p7, %p1067_p2 }
  0x74   : > { %1077 = shalt.err (!%p1074_p1)
}
  0x75   : > { %s1666_s1 = smov 4   ;;  %s1667_s10 = smov 64  }
  0x76   : > { %903 = dma.hbm_to_vmem [thread:$0]  (!%p1663_p11), %s1662_s4, 256, %s229_s17, [#allocation13], %s1667_s10, %s1667_s10, %s1666_s1  }
  0x77   : > { %s1461_s29 = scalar_lea.hbm %s1624_s0, %s1382_s12  ;;  %s246_s6 = scalar_lea.vmem [#allocation6], %s1379_s30 }
  0x78   : > { %s254_s15 = sshll.u32 %s246_s6, 4  ;;  %s1470_s13 = scalar_lea.hbm %s1626_s2, %s1382_s12  ;;  %s1464_s15 = int_to_ptr.vmem [resolvable:$true] %s254_s15 }
  0x79   : > { %s1668_s22 = sand.u32 1, %s1216_s20   ;;  %s1078_s1 = scalar_lea.hbm %s1461_s29, 64 }
  0x7a   : > { %s243_s17 = scalar_lea.sflag [#allocation7], %s1668_s22  ;;  %p1079_p3 = scmp.ne.s32.totalorder %s1461_s29, %s1078_s1 }
  0x7b   : > { %p1669_p7 = scmp.ne.s32.totalorder %s1661_s25, 0  ;;  %s1083_s8 = scalar_lea.hbm %s1624_s0, 128 }
  0x7c   : > { %p1084_p10 = scmp.lt.u32.totalorder %s1461_s29, %s1624_s0  ;;  %p1085_p6 = scmp.lt.u32.totalorder %s1083_s8, %s1078_s1 }
  0x7d   : > { %p1081_p11 = pnand %p1079_p3, %p1669_p7  ;;  %p1087_p12 = scmp.lt.u32.totalorder %s1078_s1, %s1461_s29 }
  0x7e   : > { %p1086_p8 = por %p1085_p6, %p1084_p10 }
  0x7f   : > { %p1082_p13 = pneg %p1081_p11 }
  0x80   : > { %p1088_p0 = por %p1087_p12, %p1086_p8 }
  0x82   : > { %p1089_p5 = pnand %p1088_p0, %p1082_p13 }
  0x84   : > { %1092 = shalt.err (!%p1089_p5)
}
  0x85   : > { %s1093_s12 = scalar_lea.vmem %s1464_s15, 64  ;;  %s1235_s11 = smov [#allocation6]  }
  0x86   : > { %p1094_p9 = scmp.ne.s32.totalorder %s1464_s15, %s1093_s12  ;;  %s1098_s16 = sshll.u32 %s1235_s11, 4  ;;  %s1099_s16 = int_to_ptr.vmem [resolvable:$false] %s1098_s16 }
  0x87   : > { %s1100_s4 = scalar_lea.vmem %s1099_s16, 128  ;;  %p1101_p1 = scmp.lt.s32.totalorder %s1464_s15, %s1099_s16 }
  0x88   : > { %p1096_p2 = pnand %p1094_p9, %p1669_p7  ;;  %p1102_p3 = scmp.lt.s32.totalorder %s1100_s4, %s1093_s12 }
  0x8a   : > { %p1097_p4 = pneg %p1096_p2  ;;  %p1103_p11 = por %p1102_p3, %p1101_p1 }
  0x8c   : > { %p1104_p10 = pnand %p1103_p11, %p1097_p4 }
  0x8e   : > { %1107 = shalt.err (!%p1104_p10)
}
  0x8f   : > { %p1670_p13 = scmp.ne.s32.totalorder %s1659_s14, 0  ;;  %s284_s22 = scalar_lea.vmem [#allocation11], %s1379_s30 }
  0x90   : > { %s292_s1 = sshll.u32 %s284_s22, 4  ;;  %s1108_s10 = scalar_lea.hbm %s1470_s13, 64  ;;  %s293_s1 = int_to_ptr.vmem [resolvable:$true] %s292_s1 }
  0x91   : > { %907 = dma.hbm_to_vmem [thread:$0]  (!%p1670_p13), %s1461_s29, 64, %s1464_s15, %s243_s17  }
  0x92   : > { %p1109_p6 = scmp.ne.s32.totalorder %s1470_s13, %s1108_s10  ;;  %s1113_s6 = scalar_lea.hbm %s1626_s2, 128 }
  0x93   : > { %p1114_p0 = scmp.lt.u32.totalorder %s1470_s13, %s1626_s2  ;;  %p1115_p5 = scmp.lt.u32.totalorder %s1113_s6, %s1108_s10 }
  0x94   : > { %p1111_p8 = pnand %p1109_p6, %p1669_p7  ;;  %p1117_p2 = scmp.lt.u32.totalorder %s1108_s10, %s1470_s13 }
  0x95   : > { %p1116_p9 = por %p1115_p5, %p1114_p0 }
  0x96   : > { %p1112_p12 = pneg %p1111_p8 }
  0x97   : > { %p1118_p4 = por %p1117_p2, %p1116_p9 }
  0x99   : > { %p1119_p1 = pnand %p1118_p4, %p1112_p12 }
  0x9b   : > { %1122 = shalt.err (!%p1119_p1)
}
  0x9c   : > { %s1123_s30 = scalar_lea.vmem %s293_s1, 64  ;;  %s1236_s29 = smov [#allocation11]  }
  0x9d   : > { %p1124_p3 = scmp.ne.s32.totalorder %s293_s1, %s1123_s30  ;;  %s1128_s15 = sshll.u32 %s1236_s29, 4  ;;  %s1129_s15 = int_to_ptr.vmem [resolvable:$false] %s1128_s15 }
  0x9e   : > { %s1130_s17 = scalar_lea.vmem %s1129_s15, 128  ;;  %p1131_p6 = scmp.lt.s32.totalorder %s293_s1, %s1129_s15 }
  0x9f   : > { %p1126_p11 = pnand %p1124_p3, %p1669_p7  ;;  %p1132_p8 = scmp.lt.s32.totalorder %s1130_s17, %s1123_s30 }
  0xa1   : > { %p1127_p10 = pneg %p1126_p11  ;;  %p1133_p13 = por %p1132_p8, %p1131_p6 }
  0xa3   : > { %p1134_p0 = pnand %p1133_p13, %p1127_p10 }
  0xa5   : > { %1137 = shalt.err (!%p1134_p0)
}
  0xa6   : > { %p1671_p5 = scmp.ne.s32.totalorder %s1659_s14, 0  ;;  %p1672_p12 = scmp.ne.s32.totalorder %s1652_s28, 0 }
  0xa7   : > { %s1517_s25 = sand.u32 (!%p1672_p12), 1, %s1212_s19   ;;  %p1673_p7 = scmp.ne.s32.totalorder (!%p1672_p12), %s1650_s26, 0 }
  0xa8   : > { %913 = dma.hbm_to_vmem [thread:$0]  (!%p1671_p5), %s1470_s13, 64, %s293_s1, %s1403_s3  }
  0xa9   : > { %301 = sbr.rel (%p1672_p12) target bundleno = 1440 (0x5a0), region = 40  ;;  %s1520_s16 = sshll.u32 (!%p1672_p12), %s1517_s25, 2 }
  0xaa   : > { %s304_s4 = scalar_lea.sflag (!%p1672_p12), [#allocation7], %s1517_s25  ;;  %s307_s22 = scalar_lea.vmem (!%p1672_p12), [#allocation6], %s1520_s16 }
  0xb0   : > { %1191 = dma.done.wait (%p1673_p7), %s304_s4, 64  }
  0xb1   : > { %1193 = vsyncadd (%p1673_p7), %s304_s4, 4294967232  ;;  %s312_s3 = sand.u32 1, %s1303_s24   ;;  %s316_s14 = scalar_lea.vmem [#allocation9], %s1520_s16 }
  0xb2   : > { %s313_s28 = scalar_lea.sflag [#allocation10], %s312_s3 }
  0xb3   : > { %1195 = dma.done.wait (%p1673_p7), %s313_s28, 128  }
  0xb4   : > { %1197 = vsyncadd (%p1673_p7), %s313_s28, 4294967168  ;;  %s325_s13 = scalar_lea.vmem [#allocation11], %s1520_s16  ;;  %p1674_p13 = scmp.eq.s32.totalorder %s1303_s24, 0 }
  0xb6   : > { %1199 = dma.done.wait (%p1674_p13), [#allocation13], 512   ;;  %p1675_p9 = pmov %p1674_p13 }
  0xb7   : > { %vm392_vm0 = vcmask 261120   ;;  %v1237_v0 = vmov 0.0   ;;  %vm1238_vm1 = vmmov 0   ;;  %v982_v1 = vld [vmem:[#allocation12] sm:$0xff]   ;;  %v983_v2 = vld [vmem:[#allocation12 + $0x8] sm:$0xff]   ;;  %vm438_vm2 = vcmask 257024  }
  0xb8   : > { %1201 = vsyncadd (%p1675_p9), [#allocation13], 4294966784  ;;  %853 = vmatprep.subr.bf16.mxu0 %v1237_v0  ;;  %857 = vmatprep.mubr.msk.bf16.mxu0 %vm1238_vm1, %v1237_v0  ;;  %443 = vst.msk [vmem:[#allocation5] sm:$0xff] %vm392_vm0, %v1237_v0  ;;  %v375_v3 = vld [vmem:[%s307_s22] sm:$0xf]  ;;  %vm440_vm3 = vcmask 7168  }
  0xb9   : > { %861 = vmatprep.subr.bf16.mxu1 %v1237_v0  ;;  %863 = vmatprep.mubr.msk.bf16.mxu1 %vm1238_vm1, %v1237_v0  ;;  %v445_v4 = vld [vmem:[%s316_s14] sm:$0xf]  ;;  %v1239_v13 = vmov -inf   ;;  %442 = vst.msk [vmem:[#allocation4] sm:$0xff] %vm440_vm3, %v1237_v0  ;;  %vm494_vm4 = vcmask 64512   ;;  %v1240_v19 = vmov 0  }
  0xba   : > { %854 = vmatpush3.bf16.msra.mxu0 %v982_v1  ;;  %v451_v5 = vsel %vm392_vm0, %v445_v4, 0  ;;  %441 = vst.msk [vmem:[#allocation3] sm:$0xff] %vm440_vm3, %v1239_v13  ;;  %980 = vset.pattern.permute.xlu0 %v1240_v19  ;;  %v526_v24 = vld [vmem:[%s325_s13] sm:$0xf]  ;;  %vm530_vm5 = vcmask 1043456   ;;  %v984_v39 = vld [vmem:[#allocation14] sm:$0xff]  }
  0xbb   : > { %855 = vmatprep.subr.bf16.mxu0 %v1237_v0  ;;  %862 = vmatpush3.bf16.xpose.msra.mxu1 %v451_v5  ;;  %v532_v25 = vsel %vm530_vm5, %v526_v24, 0  ;;  %v985_v40 = vld [vmem:[#allocation14 + $0x8] sm:$0xff]   ;;  %s830_s24 = sshll.u32 %s1517_s25, 3  ;;  %s840_s10 = sshll.u32 %s1220_s21, 7 }
  0xbc   : > { %873 = vmatprep.subr.bf16.mxu1 %v1237_v0  ;;  %981 = vset.pattern.permute.xlu1 %v1240_v19  ;;  %s369_s26 = scalar_lea.vmem [#allocation15], %s830_s24  ;;  %s1577_s6 = scalar_lea.hbm %s1629_s5, %s840_s10 }
  0xbd   : > { %s665_s1 = sshll.u32 %s369_s26, 4  ;;  %s651_s12 = scalar_lea.sflag [#allocation8], %s1517_s25  ;;  %s1572_s1 = int_to_ptr.vmem [resolvable:$true] %s665_s1 }
  0xbe   : > { %856 = vmatpush3.bf16.msra.mxu0 %v983_v2  ;;  %s1138_s11 = scalar_lea.vmem %s1572_s1, 128  ;;  %p1676_p4 = scmp.ne.s32.totalorder %s1657_s9, 0 }
  0xbf   : > { %867 = vmatprep.subr.bf16.mxu0 %v1237_v0  ;;  %v518_v41 = vld [vmem:[#allocation5] sm:$0xff]  ;;  %p1139_p2 = scmp.ne.s32.totalorder %s1572_s1, %s1138_s11  ;;  %s1241_s21 = smov [#allocation15]  }
  0xc0   : > { %v510_v34 = vld [vmem:[#allocation4] sm:$0xff]  ;;  %s1142_s30 = sshll.u32 %s1241_s21, 4  ;;  %s1143_s30 = int_to_ptr.vmem [resolvable:$false] %s1142_s30 }
  0xc1   : > { %858 = vmatmul.mubr.msk.bf16.vlgmr.msra.gmra.mrb[0].mxu0 %vm392_vm0, %v375_v3  ;;  %v493_v20 = vld [vmem:[#allocation3] sm:$0xff]  ;;  %p1140_p1 = pnand %p1139_p2, %p1676_p4  ;;  %s1144_s29 = scalar_lea.vmem %s1143_s30, 256 }
  0xc2   : > { %869 = vmatprep.mubr.msk.bf16.mxu0 %vm1238_vm1, %v1237_v0  ;;  %868 = vmatpush3.bf16.msra.mxu0 %v532_v25  ;;  %p1145_p11 = scmp.lt.s32.totalorder %s1572_s1, %s1143_s30  ;;  %p1146_p10 = scmp.lt.s32.totalorder %s1144_s29, %s1138_s11 }
  0xc3   : > { %p1141_p3 = pneg %p1140_p1 }
  0xc4   : > { %p1147_p6 = por %p1146_p10, %p1145_p11 }
  0xc6   : > { %p1148_p8 = pnand %p1147_p6, %p1141_p3 }
 0x194   : > { %v430_v6 = vpop.f32.mrb[0].mxu0 }
 0x195   : > { %v436_v7 = vmul.f32 0.17677669, %v430_v6  ;;  %v859_v8 = vpop.f32.mrb[1].mxu0 }
 0x196   : > { %v433_v9 = vpop.f32.mrb[2].mxu0 }
 0x197   : > { %v437_v10 = vpack.c.bf16 %v436_v7, %v436_v7  ;;  %v860_v11 = vpop.f32.mrb[3].mxu0 }
 0x199   : > { %439 = vst.msk [vmem:[#allocation2] sm:$0xf] %vm438_vm2, %v437_v10 }
 0x1a0   : > { %v444_v12 = vld [vmem:[#allocation2] sm:$0xf] }
 0x1a1   : > { %864 = vmatmul.mubr.msk.bf16.vlgmr.msra.gmra.mrb[0].mxu1 %vm392_vm0, %v444_v12 }
 0x1a2   : > { %877 = vmatprep.mubr.msk.bf16.mxu1 %vm1238_vm1, %v1237_v0  ;;  %874 = vmatpush3.bf16.msra.mxu1 %v984_v39 }
 0x1a3   : > { %875 = vmatprep.subr.bf16.mxu1 %v1237_v0 }
 0x1a6   : > { %876 = vmatpush3.bf16.msra.mxu1 %v985_v40 }
 0x274   : > { %v487_v14 = vpop.f32.mrb[0].mxu1 }
 0x275   : > { %v865_v15 = vpop.f32.mrb[1].mxu1  ;;  %v495_v16 = vsel %vm494_vm4, %v487_v14, -inf }
 0x276   : > { %496 = vmax.xlane.f32.xlu0 %v495_v16  ;;  %v490_v17 = vpop.f32.mrb[2].mxu1 }
 0x277   : > { %v866_v18 = vpop.f32.mrb[3].mxu1 }
 0x303   : > { %v497_v21 = vpop.xlane.xlu0 %496 }
 0x304   : > { %v498_v22 = vmax.f32 %v493_v20, %v497_v21 }
 0x306   : > { %v499_v23 = vsub.f32 %v493_v20, %v498_v22  ;;  %576 = vst.msk [vmem:[#allocation3] sm:$0xff] %vm440_vm3, %v498_v22  ;;  %504 = vperm.xlu0 %980, %v498_v22  }
 0x308   : > { %v500_v32 = vmul.f32 1.442695, %v499_v23 }
 0x385   : > { %v505_v26 = vpop.permute.xlu0 %504 }
 0x386   : > { %v507_v27 = vsub.f32 %v487_v14, %v505_v26 }
 0x388   : > { %v508_v28 = vmul.f32 1.442695, %v507_v27 }
 0x38a   : > { %986 = vpow2.f32 %v508_v28 }
 0x38b   : > { %988 = vpow2.f32 %v500_v32 }
 0x394   : > { %v987_v29 = vpop.eup %986 }
 0x395   : > { %v512_v30 = vsel %vm494_vm4, %v987_v29, 0.0  ;;  %v525_v31 = vpack.c.bf16 %v987_v29, %v987_v29  ;;  %v989_v33 = vpop.eup %988 }
 0x396   : > { %513 = vadd.xlane.f32.xlu1 %v512_v30  ;;  %v511_v35 = vmul.f32 %v989_v33, %v510_v34 }
 0x397   : > { %870 = vmatmul.mubr.msk.bf16.vlgmr.msra.gmra.mrb[4].mxu0 %vm494_vm4, %v525_v31 }
 0x3a7   : > { %521 = vperm.xlu1 %981, %v989_v33  }
 0x423   : > { %v514_v36 = vpop.xlane.xlu1 %513 }
 0x424   : > { %v515_v37 = vadd.f32 %v514_v36, %v511_v35 }
 0x426   : > { %517 = vst.msk [vmem:[#allocation4] sm:$0xff] %vm440_vm3, %v515_v37 }
 0x427   : > { %v522_v42 = vpop.permute.xlu1 %521 }
 0x428   : > { %v524_v43 = vmul.f32 %v522_v42, %v518_v41 }
 0x42d   : > { %v581_v38 = vld [vmem:[#allocation4] sm:$0xff] }
 0x42e   : > { %584 = vperm.xlu1 %981, %v581_v38  }
 0x46a   : > { %v568_v44 = vpop.f32.mrb[4].mxu0 }
 0x46b   : > { %v574_v45 = vadd.f32 %v568_v44, %v524_v43  ;;  %v871_v46 = vpop.f32.mrb[5].mxu0 }
 0x46c   : > { %v571_v47 = vpop.f32.mrb[6].mxu0 }
 0x46d   : > { %575 = vst.msk [vmem:[#allocation5] sm:$0xff] %vm392_vm0, %v574_v45  ;;  %v872_v48 = vpop.f32.mrb[7].mxu0 }
 0x474   : > { %v580_v51 = vld [vmem:[#allocation5] sm:$0xff] }
 0x4ad   : > { %v585_v49 = vpop.permute.xlu1 %584 }
 0x4ae   : > { %990 = vrcp.f32 %v585_v49 }
 0x4b8   : > { %v991_v50 = vpop.eup %990 }
 0x4b9   : > { %v588_v52 = vmul.f32 %v991_v50, %v580_v51 }
 0x4bb   : > { %v589_v53 = vpack.c.bf16 %v588_v52, %v588_v52 }
 0x4bd   : > { %878 = vmatmul.mubr.msk.bf16.vlgmr.msra.gmra.mrb[4].mxu1 %vm392_vm0, %v589_v53 }
 0x590   : > { %v643_v54 = vpop.f32.mrb[4].mxu1 }
 0x591   : > { %649 = vst [vmem:[%s369_s26] sm:$0xff] %v643_v54  ;;  %v879_v55 = vpop.f32.mrb[5].mxu1 }
 0x592   : > { %v646_v56 = vpop.f32.mrb[6].mxu1 }
 0x593   : > { %1151 = shalt.err (!%p1148_p8)
}
 0x594   : > { %s1152_s15 = scalar_lea.hbm %s1577_s6, 128  ;;  %s1156_s16 = scalar_lea.hbm %s1629_s5, 256 }
 0x595   : > { %p1153_p0 = scmp.ne.s32.totalorder %s1577_s6, %s1152_s15  ;;  %p1157_p7 = scmp.lt.u32.totalorder %s1577_s6, %s1629_s5 }
 0x596   : > { %p1158_p13 = scmp.lt.u32.totalorder %s1156_s16, %s1152_s15  ;;  %p1160_p2 = scmp.lt.u32.totalorder %s1152_s15, %s1577_s6 }
 0x597   : > { %p1154_p5 = pnand %p1153_p0, %p1676_p4 }
 0x598   : > { %p1159_p9 = por %p1158_p13, %p1157_p7 }
 0x599   : > { %p1155_p12 = pneg %p1154_p5 }
 0x59a   : > { %p1161_p1 = por %p1160_p2, %p1159_p9 }
 0x59c   : > { %p1162_p3 = pnand %p1161_p1, %p1155_p12 }
 0x59e   : > { %1165 = shalt.err (!%p1162_p3)
}
 0x59f   : > { %895 = dma.vmem_to_hbm [thread:$0]  (%p1676_p4), %s1572_s1, 128, %s1577_s6, %s651_s12   ;;  %v880_v57 = vpop.f32.mrb[7].mxu1 }
 0x5a0 PF: > { %s677_s3 = sand.u32 1, %s1208_s18   ;;  %p1677_p11 = scmp.ne.s32.totalorder %s1651_s27, 0 }
 0x5a1   : > { %p1678_p10 = scmp.ge.s32.totalorder %s1228_s23, 2  ;;  %s678_s28 = scalar_lea.sflag [#allocation8], %s677_s3 }
 0x5a3   : > { %p915_p6 = pnand %p1678_p10, %p1677_p11 }
 0x5a5   : > { %1203 = dma.done.wait (!%p915_p6), %s678_s28, 128  }
 0x5a6   : > { %1205 = vsyncadd (!%p915_p6), %s678_s28, 4294967168  ;;  %s25_s23 = sadd.s32 1, %s1228_s23   ;;  %s1679_s9 = sld [smem:[#allocation22_spill]] }
 0x5a7   : > { %p22_p8 = scmp.ge.s32.totalorder %s25_s23, 4   ;;  %s1680_s21 = sld [smem:[#allocation20_spill]] }
 0x5a8   : > { %s1681_s22 = sld [smem:[#allocation21_spill]]  ;;  %s1682_s18 = smov %s1212_s19 }
 0x5a9   : > { %s1683_s19 = smov %s1216_s20  ;;  %24 = sbr.rel (!%p22_p8) target bundleno = 13 (0xd), region = 125 }
 0x5ac   : > { %s1684_s20 = smov %s1679_s9 }
 0x5b0   :  { %683 = vsyncpa [#allocation7], 1 }
 0x5b1   :  { %685 = vsyncpa [#allocation7 + $0x1], 1 }
 0x5b2   :  { %686 = vsyncpa [#allocation10], 1 }
 0x5b3   :  { %688 = vsyncpa [#allocation10 + $0x1], 1 }
 0x5b4   :  { %689 = vsyncpa [#allocation13], 1 }
 0x5b5   :  { %690 = vsyncpa [#allocation8], 1 }
 0x5b6   :  { %692 = vsyncpa [#allocation8 + $0x1], 1 }

</bundles_post_ra>
